<compile_context>
chip_gen: v6e
topology: v6e:2x2x1
jax: 0.10.0
libtpu: 0.0.40
codegen_flags: <defaults>
</compile_context>

<pallas_src>
import jax
import jax.numpy as jnp
from jax import lax
from jax.experimental import pallas as pl
from jax.experimental.pallas import tpu as pltpu

K = 7            # conv kernel size (static)
HALF = K // 2    # padding = 3


def _conv7_accum(x, w, masks):
    """7-tap 'same' conv of one sample via shifted-matmul accumulation.

    x     : (Cin, L)  f32 activations (VMEM value)
    w     : (K, Cout, Cin) f32 weights, BN scale already folded in
    masks : dict {shift s != 0: (1, L) bool lane-validity mask}
    returns (Cout, L) f32
    """
    L = x.shape[-1]
    acc = None
    for k in range(K):
        s = k - HALF                                   # tap offset in [-3, 3]
        if s == 0:
            xs = x
        else:
            # xr[:, l] = x[:, (l + s) mod L]  (lane rotate on the XLU)
            xr = pltpu.roll(x, (-s) % L, 1)
            xs = jnp.where(masks[s], xr, 0.0)          # zero the wrapped lanes
        y = jnp.dot(w[k], xs, preferred_element_type=jnp.float32)
        acc = y if acc is None else acc + y
    return acc


def _basic_block_kernel(x_ref, w1_ref, w2_ref, b1_ref, b2_ref, o_ref):
    # x_ref : (nb, C, L)   single input stream; also used as the residual
    # w1_ref: (K, P, C)    conv1 weight with bn1 scale folded in
    # w2_ref: (K, P, P)    conv2 weight with bn2 scale folded in
    # b1_ref: (P, 1)       bn1 folded bias
    # b2_ref: (P, 1)       bn2 folded bias
    # o_ref : (nb, P, L)
    nb, _, L = x_ref.shape

    w1 = w1_ref[...]
    w2 = w2_ref[...]
    b1 = b1_ref[...]
    b2 = b2_ref[...]

    # Precompute the 6 lane-validity masks once; reused by both convs and all
    # nb samples (iota/broadcast is not CSE'd by JAX, so hoist it here).
    lane = lax.broadcasted_iota(jnp.int32, (1, L), 1)
    masks = {}
    for k in range(K):
        s = k - HALF
        if s == 0:
            continue
        masks[s] = (lane < (L - s)) if s > 0 else (lane >= -s)

    for b in range(nb):                       # nb is small & static -> unrolled
        xb = x_ref[b]                         # (C, L); also the residual
        out1 = _conv7_accum(xb, w1, masks)    # conv1 (+ bn1 scale)
        out1 = jnp.maximum(out1 + b1, 0.0)    # bn1 bias + relu
        # TODO(synk): Dropout(p=0.2) is identity in eval mode; training-mode
        # dropout mask is not implemented.
        out2 = _conv7_accum(out1, w2, masks)  # conv2 (+ bn2 scale)
        out2 = out2 + b2 + xb                 # bn2 bias + residual
        o_ref[b] = jnp.maximum(out2, 0.0)


def _choose_nb(N):
    """Samples per grid step: batch for bigger DMAs, but keep >=2 grid
    iterations whenever possible so v7x's two TensorCores both get work."""
    for cand in (8, 4, 2):
        if N % cand == 0 and N // cand >= 2:
            return cand
    return 1


def basic_block_1d(x, w1, w2,
                   bn1_gamma, bn1_beta, bn1_mean, bn1_var,
                   bn2_gamma, bn2_beta, bn2_mean, bn2_var,
                   eps=1e-5, nb=None):
    """x: (N, C, L) f32.  w1: (P, C, 7), w2: (P, P, 7).  Requires P == C."""
    N, C, L = x.shape
    P = w1.shape[0]
    assert P == C, "stride=1 / downsample=None requires planes == inplanes"

    if nb is None:
        nb = _choose_nb(N)
    assert N % nb == 0, "batch must be divisible by samples-per-block"

    # Fold inference BatchNorm: scale goes into the (tiny, grid-invariant)
    # conv weights, bias stays as a per-channel add in the kernel.
    s1 = bn1_gamma / jnp.sqrt(bn1_var + eps)                    # (P,)
    b1 = (bn1_beta - bn1_mean * s1).reshape(P, 1)
    s2 = bn2_gamma / jnp.sqrt(bn2_var + eps)
    b2 = (bn2_beta - bn2_mean * s2).reshape(P, 1)
    w1_k = jnp.transpose(w1, (2, 0, 1)) * s1[None, :, None]     # (K, P, C)
    w2_k = jnp.transpose(w2, (2, 0, 1)) * s2[None, :, None]     # (K, P, P)

    full3 = lambda n: (0, 0, 0)   # weights: same full block every step
    full2 = lambda n: (0, 0)      # bn biases

    # NOTE: when the caller donates x, input_output_aliases={0: 0} would let
    # the output reuse x's HBM buffer (same block index per step); not used
    # here because the test reads x again for the reference check.
    return pl.pallas_call(
        _basic_block_kernel,
        out_shape=jax.ShapeDtypeStruct((N, P, L), jnp.float32),
        grid_spec=pltpu.PrefetchScalarGridSpec(
            num_scalar_prefetch=0,
            grid=(N // nb,),
            in_specs=[
                pl.BlockSpec((nb, C, L), lambda n: (n, 0, 0)),
                pl.BlockSpec((K, P, C), full3),
                pl.BlockSpec((K, P, P), full3),
                pl.BlockSpec((P, 1), full2),
                pl.BlockSpec((P, 1), full2),
            ],
            out_specs=pl.BlockSpec((nb, P, L), lambda n: (n, 0, 0)),
        ),
        compiler_params=pltpu.CompilerParams(
            dimension_semantics=("parallel",),
            vmem_limit_bytes=48 * 1024 * 1024,
        ),
    )(x, w1_k, w2_k, b1, b2)


def _reference(x, w1, w2, g1, be1, m1, v1, g2, be2, m2, v2, eps=1e-5):
    """Pure-JAX reference for correctness checking."""
    def conv1d(a, w):
        return jax.lax.conv_general_dilated(
            a, w, window_strides=(1,), padding=[(3, 3)],
            dimension_numbers=("NCH", "OIH", "NCH"))

    def bn(a, g, b, m, v):
        return (a - m[None, :, None]) / jnp.sqrt(v[None, :, None] + eps) \
               * g[None, :, None] + b[None, :, None]

    out = jax.nn.relu(bn(conv1d(x, w1), g1, be1, m1, v1))
    out = bn(conv1d(out, w2), g2, be2, m2, v2) + x
    return jax.nn.relu(out)


if __name__ == "__main__":
    N, C, L = 2, 8, 128      # inplanes = planes = 8
    P = C

    key = jax.random.PRNGKey(0)
    ks = jax.random.split(key, 9)
    x = jax.random.normal(ks[0], (N, C, L), dtype=jnp.float32)
    w1 = jax.random.normal(ks[1], (P, C, K), dtype=jnp.float32) * 0.1
    w2 = jax.random.normal(ks[2], (P, P, K), dtype=jnp.float32) * 0.1
    bn1_gamma = 1.0 + 0.1 * jax.random.normal(ks[3], (P,), dtype=jnp.float32)
    bn1_beta = 0.1 * jax.random.normal(ks[4], (P,), dtype=jnp.float32)
    bn1_mean = 0.1 * jax.random.normal(ks[5], (P,), dtype=jnp.float32)
    bn1_var = jnp.abs(jax.random.normal(ks[6], (P,), dtype=jnp.float32)) + 0.5
    bn2_gamma = 1.0 + 0.1 * jax.random.normal(ks[7], (P,), dtype=jnp.float32)
    bn2_beta = 0.1 * jax.random.normal(ks[8], (P,), dtype=jnp.float32)
    bn2_mean = jnp.zeros((P,), dtype=jnp.float32)
    bn2_var = jnp.ones((P,), dtype=jnp.float32)

    out = basic_block_1d(x, w1, w2,
                         bn1_gamma, bn1_beta, bn1_mean, bn1_var,
                         bn2_gamma, bn2_beta, bn2_mean, bn2_var)
    out = jax.block_until_ready(out)

    ref = _reference(x, w1, w2,
                     bn1_gamma, bn1_beta, bn1_mean, bn1_var,
                     bn2_gamma, bn2_beta, bn2_mean, bn2_var)
    assert out.shape == (N, P, L)
    assert jnp.allclose(out, ref, atol=1e-4, rtol=1e-4), \
        f"max err {jnp.max(jnp.abs(out - ref))}"

    print("KERNEL_OK")
</pallas_src>

<mosaic_0001>
module attributes {stable_mosaic.version = 11 : i64} {
  func.func @_basic_block_kernel(%arg0: i32, %arg1: memref<1x8x128xf32, #tpu.memory_space<vmem>>, %arg2: memref<7x8x8xf32, #tpu.memory_space<vmem>>, %arg3: memref<7x8x8xf32, #tpu.memory_space<vmem>>, %arg4: memref<8x1xf32, #tpu.memory_space<vmem>>, %arg5: memref<8x1xf32, #tpu.memory_space<vmem>>, %arg6: memref<1x8x128xf32, #tpu.memory_space<vmem>>) attributes {dimension_semantics = [#tpu.dimension_semantics<parallel>], iteration_bounds = array<i64: 2>, scalar_prefetch = 0 : i64, scratch_operands = 0 : i64, tpu.core_type = #tpu.core_type<tc>, window_params = [{transform_indices = @transform_0, window_bounds = array<i64: 1, 8, 128>}, {pipeline_mode = #tpu.pipeline_mode<synchronous>, transform_indices = @transform_1, window_bounds = array<i64: 7, 8, 8>}, {pipeline_mode = #tpu.pipeline_mode<synchronous>, transform_indices = @transform_2, window_bounds = array<i64: 7, 8, 8>}, {pipeline_mode = #tpu.pipeline_mode<synchronous>, transform_indices = @transform_3, window_bounds = array<i64: 8, 1>}, {pipeline_mode = #tpu.pipeline_mode<synchronous>, transform_indices = @transform_4, window_bounds = array<i64: 8, 1>}, {transform_indices = @transform_5, window_bounds = array<i64: 1, 8, 128>}]} {
    %c0 = arith.constant 0 : index
    %c0_0 = arith.constant 0 : index
    %c0_1 = arith.constant 0 : index
    %0 = vector.load %arg2[%c0, %c0_0, %c0_1] : memref<7x8x8xf32, #tpu.memory_space<vmem>>, vector<7x8x8xf32>
    %c0_2 = arith.constant 0 : index
    %c0_3 = arith.constant 0 : index
    %c0_4 = arith.constant 0 : index
    %1 = vector.load %arg3[%c0_2, %c0_3, %c0_4] : memref<7x8x8xf32, #tpu.memory_space<vmem>>, vector<7x8x8xf32>
    %c0_5 = arith.constant 0 : index
    %c0_6 = arith.constant 0 : index
    %2 = vector.load %arg4[%c0_5, %c0_6] : memref<8x1xf32, #tpu.memory_space<vmem>>, vector<8x1xf32>
    %c0_7 = arith.constant 0 : index
    %c0_8 = arith.constant 0 : index
    %3 = vector.load %arg5[%c0_7, %c0_8] : memref<8x1xf32, #tpu.memory_space<vmem>>, vector<8x1xf32>
    %4 = tpu.iota {dimensions = array<i32: 1>} : vector<1x128xi32>
    %c3_i32 = arith.constant 3 : i32
    %5 = vector.broadcast %c3_i32 : i32 to vector<1x128xi32>
    %6 = arith.cmpi sge, %4, %5 : vector<1x128xi32>
    %c2_i32 = arith.constant 2 : i32
    %7 = vector.broadcast %c2_i32 : i32 to vector<1x128xi32>
    %8 = arith.cmpi sge, %4, %7 : vector<1x128xi32>
    %c1_i32 = arith.constant 1 : i32
    %9 = vector.broadcast %c1_i32 : i32 to vector<1x128xi32>
    %10 = arith.cmpi sge, %4, %9 : vector<1x128xi32>
    %c127_i32 = arith.constant 127 : i32
    %11 = vector.broadcast %c127_i32 : i32 to vector<1x128xi32>
    %12 = arith.cmpi slt, %4, %11 : vector<1x128xi32>
    %c126_i32 = arith.constant 126 : i32
    %13 = vector.broadcast %c126_i32 : i32 to vector<1x128xi32>
    %14 = arith.cmpi slt, %4, %13 : vector<1x128xi32>
    %c125_i32 = arith.constant 125 : i32
    %15 = vector.broadcast %c125_i32 : i32 to vector<1x128xi32>
    %16 = arith.cmpi slt, %4, %15 : vector<1x128xi32>
    %c0_9 = arith.constant 0 : index
    %c0_10 = arith.constant 0 : index
    %c0_11 = arith.constant 0 : index
    %17 = vector.load %arg1[%c0_9, %c0_10, %c0_11] : memref<1x8x128xf32, #tpu.memory_space<vmem>>, vector<1x8x128xf32>
    %18 = vector.shape_cast %17 : vector<1x8x128xf32> to vector<8x128xf32>
    %c3_i32_12 = arith.constant 3 : i32
    %19 = tpu.dynamic_rotate %18 by %c3_i32_12 dim 1 : vector<8x128xf32>, i32 -> vector<8x128xf32>
    %cst = arith.constant 0.000000e+00 : f32
    %20 = vector.shape_cast %6 : vector<1x128xi1> to vector<1x128xi1>
    %21 = vector.broadcast %20 : vector<1x128xi1> to vector<8x128xi1>
    %22 = vector.broadcast %cst : f32 to vector<8x128xf32>
    %23 = arith.select %21, %19, %22 : vector<8x128xi1>, vector<8x128xf32>
    %24 = vector.extract_strided_slice %0 {offsets = [0, 0, 0], sizes = [1, 8, 8], strides = [1, 1, 1]} : vector<7x8x8xf32> to vector<1x8x8xf32>
    %25 = vector.shape_cast %24 : vector<1x8x8xf32> to vector<8x8xf32>
    %cst_13 = arith.constant dense<0.000000e+00> : vector<8x128xf32>
    %26 = tpu.matmul %25, %23, %cst_13 {dimension_numbers = #tpu.dot_dimension_numbers<[1], [0], [0], [1], [0, 0, 1, 1], [], []>} : vector<8x8xf32>, vector<8x128xf32>, vector<8x128xf32> -> vector<8x128xf32>
    %c2_i32_14 = arith.constant 2 : i32
    %27 = tpu.dynamic_rotate %18 by %c2_i32_14 dim 1 : vector<8x128xf32>, i32 -> vector<8x128xf32>
    %cst_15 = arith.constant 0.000000e+00 : f32
    %28 = vector.shape_cast %8 : vector<1x128xi1> to vector<1x128xi1>
    %29 = vector.broadcast %28 : vector<1x128xi1> to vector<8x128xi1>
    %30 = vector.broadcast %cst_15 : f32 to vector<8x128xf32>
    %31 = arith.select %29, %27, %30 : vector<8x128xi1>, vector<8x128xf32>
    %32 = vector.extract_strided_slice %0 {offsets = [1, 0, 0], sizes = [1, 8, 8], strides = [1, 1, 1]} : vector<7x8x8xf32> to vector<1x8x8xf32>
    %33 = vector.shape_cast %32 : vector<1x8x8xf32> to vector<8x8xf32>
    %cst_16 = arith.constant dense<0.000000e+00> : vector<8x128xf32>
    %34 = tpu.matmul %33, %31, %cst_16 {dimension_numbers = #tpu.dot_dimension_numbers<[1], [0], [0], [1], [0, 0, 1, 1], [], []>} : vector<8x8xf32>, vector<8x128xf32>, vector<8x128xf32> -> vector<8x128xf32>
    %35 = arith.addf %26, %34 : vector<8x128xf32>
    %c1_i32_17 = arith.constant 1 : i32
    %36 = tpu.dynamic_rotate %18 by %c1_i32_17 dim 1 : vector<8x128xf32>, i32 -> vector<8x128xf32>
    %cst_18 = arith.constant 0.000000e+00 : f32
    %37 = vector.shape_cast %10 : vector<1x128xi1> to vector<1x128xi1>
    %38 = vector.broadcast %37 : vector<1x128xi1> to vector<8x128xi1>
    %39 = vector.broadcast %cst_18 : f32 to vector<8x128xf32>
    %40 = arith.select %38, %36, %39 : vector<8x128xi1>, vector<8x128xf32>
    %41 = vector.extract_strided_slice %0 {offsets = [2, 0, 0], sizes = [1, 8, 8], strides = [1, 1, 1]} : vector<7x8x8xf32> to vector<1x8x8xf32>
    %42 = vector.shape_cast %41 : vector<1x8x8xf32> to vector<8x8xf32>
    %cst_19 = arith.constant dense<0.000000e+00> : vector<8x128xf32>
    %43 = tpu.matmul %42, %40, %cst_19 {dimension_numbers = #tpu.dot_dimension_numbers<[1], [0], [0], [1], [0, 0, 1, 1], [], []>} : vector<8x8xf32>, vector<8x128xf32>, vector<8x128xf32> -> vector<8x128xf32>
    %44 = arith.addf %35, %43 : vector<8x128xf32>
    %45 = vector.extract_strided_slice %0 {offsets = [3, 0, 0], sizes = [1, 8, 8], strides = [1, 1, 1]} : vector<7x8x8xf32> to vector<1x8x8xf32>
    %46 = vector.shape_cast %45 : vector<1x8x8xf32> to vector<8x8xf32>
    %cst_20 = arith.constant dense<0.000000e+00> : vector<8x128xf32>
    %47 = tpu.matmul %46, %18, %cst_20 {dimension_numbers = #tpu.dot_dimension_numbers<[1], [0], [0], [1], [0, 0, 1, 1], [], []>} : vector<8x8xf32>, vector<8x128xf32>, vector<8x128xf32> -> vector<8x128xf32>
    %48 = arith.addf %44, %47 : vector<8x128xf32>
    %c127_i32_21 = arith.constant 127 : i32
    %49 = tpu.dynamic_rotate %18 by %c127_i32_21 dim 1 : vector<8x128xf32>, i32 -> vector<8x128xf32>
    %cst_22 = arith.constant 0.000000e+00 : f32
    %50 = vector.shape_cast %12 : vector<1x128xi1> to vector<1x128xi1>
    %51 = vector.broadcast %50 : vector<1x128xi1> to vector<8x128xi1>
    %52 = vector.broadcast %cst_22 : f32 to vector<8x128xf32>
    %53 = arith.select %51, %49, %52 : vector<8x128xi1>, vector<8x128xf32>
    %54 = vector.extract_strided_slice %0 {offsets = [4, 0, 0], sizes = [1, 8, 8], strides = [1, 1, 1]} : vector<7x8x8xf32> to vector<1x8x8xf32>
    %55 = vector.shape_cast %54 : vector<1x8x8xf32> to vector<8x8xf32>
    %cst_23 = arith.constant dense<0.000000e+00> : vector<8x128xf32>
    %56 = tpu.matmul %55, %53, %cst_23 {dimension_numbers = #tpu.dot_dimension_numbers<[1], [0], [0], [1], [0, 0, 1, 1], [], []>} : vector<8x8xf32>, vector<8x128xf32>, vector<8x128xf32> -> vector<8x128xf32>
    %57 = arith.addf %48, %56 : vector<8x128xf32>
    %c126_i32_24 = arith.constant 126 : i32
    %58 = tpu.dynamic_rotate %18 by %c126_i32_24 dim 1 : vector<8x128xf32>, i32 -> vector<8x128xf32>
    %cst_25 = arith.constant 0.000000e+00 : f32
    %59 = vector.shape_cast %14 : vector<1x128xi1> to vector<1x128xi1>
    %60 = vector.broadcast %59 : vector<1x128xi1> to vector<8x128xi1>
    %61 = vector.broadcast %cst_25 : f32 to vector<8x128xf32>
    %62 = arith.select %60, %58, %61 : vector<8x128xi1>, vector<8x128xf32>
    %63 = vector.extract_strided_slice %0 {offsets = [5, 0, 0], sizes = [1, 8, 8], strides = [1, 1, 1]} : vector<7x8x8xf32> to vector<1x8x8xf32>
    %64 = vector.shape_cast %63 : vector<1x8x8xf32> to vector<8x8xf32>
    %cst_26 = arith.constant dense<0.000000e+00> : vector<8x128xf32>
    %65 = tpu.matmul %64, %62, %cst_26 {dimension_numbers = #tpu.dot_dimension_numbers<[1], [0], [0], [1], [0, 0, 1, 1], [], []>} : vector<8x8xf32>, vector<8x128xf32>, vector<8x128xf32> -> vector<8x128xf32>
    %66 = arith.addf %57, %65 : vector<8x128xf32>
    %c125_i32_27 = arith.constant 125 : i32
    %67 = tpu.dynamic_rotate %18 by %c125_i32_27 dim 1 : vector<8x128xf32>, i32 -> vector<8x128xf32>
    %cst_28 = arith.constant 0.000000e+00 : f32
    %68 = vector.shape_cast %16 : vector<1x128xi1> to vector<1x128xi1>
    %69 = vector.broadcast %68 : vector<1x128xi1> to vector<8x128xi1>
    %70 = vector.broadcast %cst_28 : f32 to vector<8x128xf32>
    %71 = arith.select %69, %67, %70 : vector<8x128xi1>, vector<8x128xf32>
    %72 = vector.extract_strided_slice %0 {offsets = [6, 0, 0], sizes = [1, 8, 8], strides = [1, 1, 1]} : vector<7x8x8xf32> to vector<1x8x8xf32>
    %73 = vector.shape_cast %72 : vector<1x8x8xf32> to vector<8x8xf32>
    %cst_29 = arith.constant dense<0.000000e+00> : vector<8x128xf32>
    %74 = tpu.matmul %73, %71, %cst_29 {dimension_numbers = #tpu.dot_dimension_numbers<[1], [0], [0], [1], [0, 0, 1, 1], [], []>} : vector<8x8xf32>, vector<8x128xf32>, vector<8x128xf32> -> vector<8x128xf32>
    %75 = arith.addf %66, %74 : vector<8x128xf32>
    %76 = vector.broadcast %2 : vector<8x1xf32> to vector<8x128xf32>
    %77 = arith.addf %75, %76 : vector<8x128xf32>
    %cst_30 = arith.constant 0.000000e+00 : f32
    %78 = vector.broadcast %cst_30 : f32 to vector<8x128xf32>
    %79 = arith.maximumf %77, %78 : vector<8x128xf32>
    %c3_i32_31 = arith.constant 3 : i32
    %80 = tpu.dynamic_rotate %79 by %c3_i32_31 dim 1 : vector<8x128xf32>, i32 -> vector<8x128xf32>
    %cst_32 = arith.constant 0.000000e+00 : f32
    %81 = vector.shape_cast %6 : vector<1x128xi1> to vector<1x128xi1>
    %82 = vector.broadcast %81 : vector<1x128xi1> to vector<8x128xi1>
    %83 = vector.broadcast %cst_32 : f32 to vector<8x128xf32>
    %84 = arith.select %82, %80, %83 : vector<8x128xi1>, vector<8x128xf32>
    %85 = vector.extract_strided_slice %1 {offsets = [0, 0, 0], sizes = [1, 8, 8], strides = [1, 1, 1]} : vector<7x8x8xf32> to vector<1x8x8xf32>
    %86 = vector.shape_cast %85 : vector<1x8x8xf32> to vector<8x8xf32>
    %cst_33 = arith.constant dense<0.000000e+00> : vector<8x128xf32>
    %87 = tpu.matmul %86, %84, %cst_33 {dimension_numbers = #tpu.dot_dimension_numbers<[1], [0], [0], [1], [0, 0, 1, 1], [], []>} : vector<8x8xf32>, vector<8x128xf32>, vector<8x128xf32> -> vector<8x128xf32>
    %c2_i32_34 = arith.constant 2 : i32
    %88 = tpu.dynamic_rotate %79 by %c2_i32_34 dim 1 : vector<8x128xf32>, i32 -> vector<8x128xf32>
    %cst_35 = arith.constant 0.000000e+00 : f32
    %89 = vector.shape_cast %8 : vector<1x128xi1> to vector<1x128xi1>
    %90 = vector.broadcast %89 : vector<1x128xi1> to vector<8x128xi1>
    %91 = vector.broadcast %cst_35 : f32 to vector<8x128xf32>
    %92 = arith.select %90, %88, %91 : vector<8x128xi1>, vector<8x128xf32>
    %93 = vector.extract_strided_slice %1 {offsets = [1, 0, 0], sizes = [1, 8, 8], strides = [1, 1, 1]} : vector<7x8x8xf32> to vector<1x8x8xf32>
    %94 = vector.shape_cast %93 : vector<1x8x8xf32> to vector<8x8xf32>
    %cst_36 = arith.constant dense<0.000000e+00> : vector<8x128xf32>
    %95 = tpu.matmul %94, %92, %cst_36 {dimension_numbers = #tpu.dot_dimension_numbers<[1], [0], [0], [1], [0, 0, 1, 1], [], []>} : vector<8x8xf32>, vector<8x128xf32>, vector<8x128xf32> -> vector<8x128xf32>
    %96 = arith.addf %87, %95 : vector<8x128xf32>
    %c1_i32_37 = arith.constant 1 : i32
    %97 = tpu.dynamic_rotate %79 by %c1_i32_37 dim 1 : vector<8x128xf32>, i32 -> vector<8x128xf32>
    %cst_38 = arith.constant 0.000000e+00 : f32
    %98 = vector.shape_cast %10 : vector<1x128xi1> to vector<1x128xi1>
    %99 = vector.broadcast %98 : vector<1x128xi1> to vector<8x128xi1>
    %100 = vector.broadcast %cst_38 : f32 to vector<8x128xf32>
    %101 = arith.select %99, %97, %100 : vector<8x128xi1>, vector<8x128xf32>
    %102 = vector.extract_strided_slice %1 {offsets = [2, 0, 0], sizes = [1, 8, 8], strides = [1, 1, 1]} : vector<7x8x8xf32> to vector<1x8x8xf32>
    %103 = vector.shape_cast %102 : vector<1x8x8xf32> to vector<8x8xf32>
    %cst_39 = arith.constant dense<0.000000e+00> : vector<8x128xf32>
    %104 = tpu.matmul %103, %101, %cst_39 {dimension_numbers = #tpu.dot_dimension_numbers<[1], [0], [0], [1], [0, 0, 1, 1], [], []>} : vector<8x8xf32>, vector<8x128xf32>, vector<8x128xf32> -> vector<8x128xf32>
    %105 = arith.addf %96, %104 : vector<8x128xf32>
    %106 = vector.extract_strided_slice %1 {offsets = [3, 0, 0], sizes = [1, 8, 8], strides = [1, 1, 1]} : vector<7x8x8xf32> to vector<1x8x8xf32>
    %107 = vector.shape_cast %106 : vector<1x8x8xf32> to vector<8x8xf32>
    %cst_40 = arith.constant dense<0.000000e+00> : vector<8x128xf32>
    %108 = tpu.matmul %107, %79, %cst_40 {dimension_numbers = #tpu.dot_dimension_numbers<[1], [0], [0], [1], [0, 0, 1, 1], [], []>} : vector<8x8xf32>, vector<8x128xf32>, vector<8x128xf32> -> vector<8x128xf32>
    %109 = arith.addf %105, %108 : vector<8x128xf32>
    %c127_i32_41 = arith.constant 127 : i32
    %110 = tpu.dynamic_rotate %79 by %c127_i32_41 dim 1 : vector<8x128xf32>, i32 -> vector<8x128xf32>
    %cst_42 = arith.constant 0.000000e+00 : f32
    %111 = vector.shape_cast %12 : vector<1x128xi1> to vector<1x128xi1>
    %112 = vector.broadcast %111 : vector<1x128xi1> to vector<8x128xi1>
    %113 = vector.broadcast %cst_42 : f32 to vector<8x128xf32>
    %114 = arith.select %112, %110, %113 : vector<8x128xi1>, vector<8x128xf32>
    %115 = vector.extract_strided_slice %1 {offsets = [4, 0, 0], sizes = [1, 8, 8], strides = [1, 1, 1]} : vector<7x8x8xf32> to vector<1x8x8xf32>
    %116 = vector.shape_cast %115 : vector<1x8x8xf32> to vector<8x8xf32>
    %cst_43 = arith.constant dense<0.000000e+00> : vector<8x128xf32>
    %117 = tpu.matmul %116, %114, %cst_43 {dimension_numbers = #tpu.dot_dimension_numbers<[1], [0], [0], [1], [0, 0, 1, 1], [], []>} : vector<8x8xf32>, vector<8x128xf32>, vector<8x128xf32> -> vector<8x128xf32>
    %118 = arith.addf %109, %117 : vector<8x128xf32>
    %c126_i32_44 = arith.constant 126 : i32
    %119 = tpu.dynamic_rotate %79 by %c126_i32_44 dim 1 : vector<8x128xf32>, i32 -> vector<8x128xf32>
    %cst_45 = arith.constant 0.000000e+00 : f32
    %120 = vector.shape_cast %14 : vector<1x128xi1> to vector<1x128xi1>
    %121 = vector.broadcast %120 : vector<1x128xi1> to vector<8x128xi1>
    %122 = vector.broadcast %cst_45 : f32 to vector<8x128xf32>
    %123 = arith.select %121, %119, %122 : vector<8x128xi1>, vector<8x128xf32>
    %124 = vector.extract_strided_slice %1 {offsets = [5, 0, 0], sizes = [1, 8, 8], strides = [1, 1, 1]} : vector<7x8x8xf32> to vector<1x8x8xf32>
    %125 = vector.shape_cast %124 : vector<1x8x8xf32> to vector<8x8xf32>
    %cst_46 = arith.constant dense<0.000000e+00> : vector<8x128xf32>
    %126 = tpu.matmul %125, %123, %cst_46 {dimension_numbers = #tpu.dot_dimension_numbers<[1], [0], [0], [1], [0, 0, 1, 1], [], []>} : vector<8x8xf32>, vector<8x128xf32>, vector<8x128xf32> -> vector<8x128xf32>
    %127 = arith.addf %118, %126 : vector<8x128xf32>
    %c125_i32_47 = arith.constant 125 : i32
    %128 = tpu.dynamic_rotate %79 by %c125_i32_47 dim 1 : vector<8x128xf32>, i32 -> vector<8x128xf32>
    %cst_48 = arith.constant 0.000000e+00 : f32
    %129 = vector.shape_cast %16 : vector<1x128xi1> to vector<1x128xi1>
    %130 = vector.broadcast %129 : vector<1x128xi1> to vector<8x128xi1>
    %131 = vector.broadcast %cst_48 : f32 to vector<8x128xf32>
    %132 = arith.select %130, %128, %131 : vector<8x128xi1>, vector<8x128xf32>
    %133 = vector.extract_strided_slice %1 {offsets = [6, 0, 0], sizes = [1, 8, 8], strides = [1, 1, 1]} : vector<7x8x8xf32> to vector<1x8x8xf32>
    %134 = vector.shape_cast %133 : vector<1x8x8xf32> to vector<8x8xf32>
    %cst_49 = arith.constant dense<0.000000e+00> : vector<8x128xf32>
    %135 = tpu.matmul %134, %132, %cst_49 {dimension_numbers = #tpu.dot_dimension_numbers<[1], [0], [0], [1], [0, 0, 1, 1], [], []>} : vector<8x8xf32>, vector<8x128xf32>, vector<8x128xf32> -> vector<8x128xf32>
    %136 = arith.addf %127, %135 : vector<8x128xf32>
    %137 = vector.broadcast %3 : vector<8x1xf32> to vector<8x128xf32>
    %138 = arith.addf %136, %137 : vector<8x128xf32>
    %139 = arith.addf %138, %18 : vector<8x128xf32>
    %cst_50 = arith.constant 0.000000e+00 : f32
    %140 = vector.broadcast %cst_50 : f32 to vector<8x128xf32>
    %141 = arith.maximumf %139, %140 : vector<8x128xf32>
    %c0_51 = arith.constant 0 : index
    %c0_52 = arith.constant 0 : index
    %c0_53 = arith.constant 0 : index
    %142 = vector.load %arg6[%c0_51, %c0_52, %c0_53] : memref<1x8x128xf32, #tpu.memory_space<vmem>>, vector<1x8x128xf32>
    %143 = vector.shape_cast %142 : vector<1x8x128xf32> to vector<8x128xf32>
    %144 = vector.shape_cast %141 : vector<8x128xf32> to vector<1x8x128xf32>
    tpu.vector_store %arg6[%c0_51, %c0_52, %c0_53], %144 {strides = array<i32>} : memref<1x8x128xf32, #tpu.memory_space<vmem>>, vector<1x8x128xf32>,
    return
  }
  func.func @transform_0(%arg0: i32) -> (i32, i32, i32) {
    %c0_i32 = arith.constant 0 : i32
    %c0_i32_0 = arith.constant 0 : i32
    %c0_i32_1 = arith.constant 0 : i32
    return %arg0, %c0_i32, %c0_i32_0 : i32, i32, i32
  }
  func.func @transform_1(%arg0: i32) -> (i32, i32, i32) {
    %c0_i32 = arith.constant 0 : i32
    %c0_i32_0 = arith.constant 0 : i32
    %c0_i32_1 = arith.constant 0 : i32
    %c0_i32_2 = arith.constant 0 : i32
    return %c0_i32, %c0_i32_0, %c0_i32_1 : i32, i32, i32
  }
  func.func @transform_2(%arg0: i32) -> (i32, i32, i32) {
    %c0_i32 = arith.constant 0 : i32
    %c0_i32_0 = arith.constant 0 : i32
    %c0_i32_1 = arith.constant 0 : i32
    %c0_i32_2 = arith.constant 0 : i32
    return %c0_i32, %c0_i32_0, %c0_i32_1 : i32, i32, i32
  }
  func.func @transform_3(%arg0: i32) -> (i32, i32) {
    %c0_i32 = arith.constant 0 : i32
    %c0_i32_0 = arith.constant 0 : i32
    %c0_i32_1 = arith.constant 0 : i32
    return %c0_i32, %c0_i32_0 : i32, i32
  }
  func.func @transform_4(%arg0: i32) -> (i32, i32) {
    %c0_i32 = arith.constant 0 : i32
    %c0_i32_0 = arith.constant 0 : i32
    %c0_i32_1 = arith.constant 0 : i32
    return %c0_i32, %c0_i32_0 : i32, i32
  }
  func.func @transform_5(%arg0: i32) -> (i32, i32, i32) {
    %c0_i32 = arith.constant 0 : i32
    %c0_i32_0 = arith.constant 0 : i32
    %c0_i32_1 = arith.constant 0 : i32
    return %arg0, %c0_i32, %c0_i32_0 : i32, i32, i32
  }
}

</mosaic_0001>

<bundles_post_ra>
// kernel: tpu_custom_call.1
= control target key start
LH: loop header
LB: loop body
LE: loop exit
PB: predicated region body
PF: predicated region fallthrough
CT: control target
= control target key end

     0   :  { %10 = vsyncpa [#allocation3], 0  ;;  %s2087_s0 = inlined_call_operand.vmem [shape: f32[2,8,128], index: 0, kind: input, shape index: {}]   ;;  %s2088_s1 = inlined_call_operand.hbm [shape: f32[7,8,8], index: 1, kind: input, shape index: {}]   ;;  %s2089_s2 = inlined_call_operand.hbm [shape: f32[7,8,8], index: 2, kind: input, shape index: {}]   ;;  %s2090_s3 = inlined_call_operand.vmem [shape: f32[8,1], index: 3, kind: input, shape index: {}]   ;;  %s2091_s4 = inlined_call_operand.vmem [shape: f32[8,1], index: 4, kind: input, shape index: {}]   ;;  %s2092_s5 = inlined_call_operand.hbm [shape: f32[2,8,128], index: 5, kind: output, shape index: {}]  }
   0x1   :  { %11 = vsyncpa [#allocation6], 0 }
   0x2   :  { %12 = vsyncpa [#allocation4], 0 }
   0x3   :  { %14 = vsyncpa [#allocation4 + $0x1], 0  ;;  %s1843_s18 = smov 0   ;;  %s1845_s19 = smov 0  }
   0x4   :  { %s1847_s20 = smov 0   ;;  %s1849_s21 = smov 0  }
   0x5 LB: > { %s1864_s22 = sadd.s32 4294967295, %s1797_s21   ;;  %s1467_s23 = sadd.s32 4294967294, %s1797_s21   ;;  %s1797_s21 = sphi %s1849_s21, %s2106_s21   ;;  %s1793_s20 = sphi %s1847_s20, %s2105_s20   ;;  %s1789_s19 = sphi %s1845_s19, %s2104_s19   ;;  %s1785_s18 = sphi %s1843_s18, %s2103_s18  }
   0x6   : > { %s1868_s24 = sadd.s32 1, %s1797_s21   ;;  %s137_s25 = sadd.s32 1, %s1793_s20 }
   0x7   : > { %s134_s26 = ssub.s32 %s1797_s21, %s1868_s24  ;;  %p147_p0 = scmp.ne.s32.totalorder %s1793_s20, %s1789_s19 }
   0x8   : > { %p135_p1 = scmp.eq.s32.totalorder %s134_s26, 0  ;;  %p148_p2 = scmp.eq.s32.totalorder %s1864_s22, 1 }
   0x9   : > { %p153_p3 = scmp.ne.s32.totalorder %s1789_s19, %s1785_s18  ;;  %p154_p4 = scmp.eq.s32.totalorder %s1467_s23, 1 }
   0xa   : > { %s1879_s27 = scalar_select %p135_p1, %s1793_s20, %s137_s25  }
   0xb   : > { %p1881_p5 = por %p148_p2, %p147_p0  ;;  %p1885_p6 = por %p154_p4, %p153_p3 }
   0xc   : > { %p1468_p7 = scmp.ge.s32.totalorder %s1797_s21, 1  ;;  %p161_p8 = scmp.lt.s32.totalorder %s1797_s21, 3 }
   0xd   : > { %s2095_s29 = scalar_select %p1885_p6, 1, 0 }
   0xe   : > { %p2093_p9 = scmp.eq.s32.totalorder %s1864_s22, 0  ;;  %p1892_p10 = pnand %p1468_p7, %p161_p8 }
   0xf   : > { %s1799_s6 = smov [#allocation2]   ;;  %s1800_s9 = smov [#allocation5]  }
  0x10   : > { %s173_s7 = sshll.u32 %s1799_s6, 4  ;;  %p1615_p11 = pneg %p1892_p10  ;;  %s174_s7 = int_to_ptr.vmem [resolvable:$true] %s173_s7 }
  0x11   : > { %s186_s10 = sshll.u32 %s1800_s9, 4  ;;  %s1688_s11 = scalar_lea.vmem %s174_s7, 896  ;;  %s187_s10 = int_to_ptr.vmem [resolvable:$true] %s186_s10 }
  0x12   : > { %p1900_p12 = pnand %p2093_p9, %p1615_p11  ;;  %p1689_p0 = scmp.ne.s32.totalorder %s174_s7, %s1688_s11 }
  0x13   : > { %p1696_p3 = scmp.lt.s32.totalorder %s174_s7, %s174_s7  ;;  %p1697_p4 = scmp.lt.s32.totalorder %s1688_s11, %s1688_s11 }
  0x14   : > { %p1679_p13 = pneg %p1900_p12 }
  0x15   : > { %p1698_p7 = por %p1697_p4, %p1696_p3 }
  0x16   : > { %p1691_p1 = pnand %p1689_p0, %p1679_p13 }
  0x18   : > { %p1692_p2 = pneg %p1691_p1 }
  0x1a   : > { %p1699_p8 = pnand %p1698_p7, %p1692_p2 }
  0x1c   : > { %1702 = shalt.err (!%p1699_p8)
}
  0x1d   : > { %s1801_s12 = smov 128   ;;  %s1802_s13 = smov 8  }
  0x1e   : > { %1618 = dma.hbm_to_vmem [thread:$0]  (!%p1900_p12), %s2088_s1, 896, %s174_s7, [#allocation3], %s1801_s12, %s1801_s12, %s1802_s13  }
  0x1f   : > { %s1714_s16 = scalar_lea.vmem %s187_s10, 896  ;;  %p1722_p9 = scmp.lt.s32.totalorder %s187_s10, %s187_s10 }
  0x20   : > { %p1715_p11 = scmp.ne.s32.totalorder %s187_s10, %s1714_s16  ;;  %p1723_p6 = scmp.lt.s32.totalorder %s1714_s16, %s1714_s16 }
  0x22   : > { %p1717_p0 = pnand %p1715_p11, %p1679_p13  ;;  %p1724_p3 = por %p1723_p6, %p1722_p9 }
  0x24   : > { %p1718_p1 = pneg %p1717_p0 }
  0x26   : > { %p1725_p2 = pnand %p1724_p3, %p1718_p1 }
  0x28   : > { %1728 = shalt.err (!%p1725_p2)
}
  0x29   : > { %1621 = dma.hbm_to_vmem [thread:$0]  (!%p1900_p12), %s2089_s2, 896, %s187_s10, [#allocation6], %s1801_s12, %s1801_s12, %s1802_s13  }
  0x2a   : > { %215 = sbr.rel (%p1892_p10) target bundleno = 731 (0x2db), region = 40  ;;  %p2098_p4 = scmp.eq.s32.totalorder (!%p1892_p10), %s1864_s22, 0 }
  0x2f   : > { %1772 = dma.done.wait (%p2098_p4), [#allocation3], 896   ;;  %p2099_p13 = pmov %p2098_p4 }
  0x30   : > { %p2100_p7 = pmov %p2098_p4 }
  0x31   : > { %1774 = vsyncadd (%p2099_p13), [#allocation3], 4294966400 }
  0x32   : > { %1776 = dma.done.wait (%p2100_p7), [#allocation6], 896   ;;  %p2101_p6 = pmov %p2098_p4 }
  0x33   : > { %p246_p9 = scmp.lt.s32.totalorder %s1864_s22, 1  ;;  %v1803_v0 = vmov 0.0   ;;  %vm1804_vm0 = vmmov 0   ;;  %s1805_s8 = smov 2   ;;  %v1807_v2 = vmov 0   ;;  %v264_v3 = vld [vmem:[%s2090_s3] sm:$0xff]  ;;  %v266_v4 = vlaneseq }
  0x34   : > { %1778 = vsyncadd (%p2101_p6), [#allocation6], 4294966400  ;;  %1535 = vmatprep.subr.mxu0 %v1803_v0  ;;  %1537 = vmatprep.mubr.msk.f32.mxu0 %vm1804_vm0, %v1803_v0  ;;  %s1806_s9 = smov 1   ;;  %s1808_s10 = smov 3   ;;  %v251_v6 = vld [vmem:[#allocation2 + $0x8] sm:$0xff]  ;;  %vm285_vm2 = vcmask 64512  }
  0x35   : > { %s247_s25 = scalar_select %p246_p9, %s1864_s22, 1  ;;  %1540 = vmatprep.subr.mxu1 %v1803_v0  ;;  %1542 = vmatprep.mubr.msk.f32.mxu1 %vm1804_vm0, %v1803_v0  ;;  %v1960_v5 = vand.u32 127, %v266_v4  ;;  %v250_v9 = vld [vmem:[#allocation2] sm:$0xff]  ;;  %v252_v10 = vld [vmem:[#allocation2 + $0x10] sm:$0xff]  ;;  %v253_v13 = vld [vmem:[#allocation2 + $0x18] sm:$0xff] }
  0x36   : > { %1676 = vset.pattern.permute.xlu0 %v1807_v2  ;;  %s1809_s11 = smov 127   ;;  %s1810_s12 = smov 125   ;;  %v254_v14 = vld [vmem:[#allocation2 + $0x20] sm:$0xff]  ;;  %v255_v17 = vld [vmem:[#allocation2 + $0x28] sm:$0xff]  ;;  %v256_v18 = vld [vmem:[#allocation2 + $0x30] sm:$0xff] }
  0x37   : > { %s1476_s26 = sshll.u32 %s247_s25, 3  ;;  %s1811_s13 = smov 126   ;;  %vm269_vm1 = vcmp.ge.s32.totalorder %v1960_v5, 2  ;;  %vm270_vm3 = vcmp.ge.s32.totalorder %v1960_v5, 1  ;;  %vm268_vm4 = vcmp.ge.s32.totalorder %v1960_v5, 3  ;;  %vm271_vm5 = vcmp.lt.s32.totalorder %v1960_v5, 127 }
  0x38   : > { %s249_s7 = scalar_lea.vmem %s2087_s0, %s1476_s26  ;;  %vm272_vm6 = vcmp.lt.s32.totalorder %v1960_v5, 126  ;;  %vm273_vm7 = vcmp.lt.s32.totalorder %v1960_v5, 125  ;;  %v265_v42 = vld [vmem:[%s2091_s4] sm:$0xff]  ;;  %v257_v46 = vld [vmem:[#allocation5] sm:$0xff]  ;;  %v259_v48 = vld [vmem:[#allocation5 + $0x10] sm:$0xff]  ;;  %s243_s23 = sand.u32 1, %s1789_s19  }
  0x39   : > { %v1943_v1 = vld [vmem:[%s249_s7] sm:$0xff]  ;;  %v260_v49 = vld [vmem:[#allocation5 + $0x18] sm:$0xff]  ;;  %v261_v51 = vld [vmem:[#allocation5 + $0x20] sm:$0xff]  ;;  %s1475_s25 = sshll.u32 %s243_s23, 3  ;;  %s1504_s26 = sshll.u32 %s1864_s22, 7 }
  0x3a   : > { %280 = vrot.lane.b32.xlu0 %v1943_v1, %s1805_s8  ;;  %432 = vrot.lane.b32.xlu1 %v1943_v1, %s1806_s9  ;;  %v258_v43 = vld [vmem:[#allocation5 + $0x8] sm:$0xff]  ;;  %v263_v55 = vld [vmem:[#allocation5 + $0x30] sm:$0xff]  ;;  %s245_s30 = scalar_lea.vmem [#allocation7], %s1475_s25 }
  0x3b   : > { %v262_v53 = vld [vmem:[#allocation5 + $0x28] sm:$0xff]  ;;  %s1386_s6 = sshll.u32 %s245_s30, 4  ;;  %s1387_s6 = int_to_ptr.vmem [resolvable:$true] %s1386_s6 }
  0x3e   : > { %275 = vrot.lane.b32.xlu0 %v1943_v1, %s1808_s10  ;;  %585 = vrot.lane.b32.xlu1 %v1943_v1, %s1809_s11 }
  0x42   : > { %743 = vrot.lane.b32.xlu1 %v1943_v1, %s1810_s12  ;;  %664 = vrot.lane.b32.xlu0 %v1943_v1, %s1811_s13 }
  0x46   : > { %824 = vperm.xlu0 %1676, %v264_v3  }
  0xac   : > { %v281_v7 = vpop.permute.xlu0 %280  ;;  %v433_v8 = vpop.permute.xlu1 %432 }
  0xad   : > { %1536 = vmatpush3.msk.msra.mxu0 %vm269_vm1, %v281_v7 }
  0xae   : > { %1538 = vmatmul.mubr.msk.f32.vlgmr.msra.gmra.mxu0 %vm285_vm2, %v251_v6  ;;  %1545 = vmatprep.subr.mxu0 %v1803_v0 }
  0xaf   : > { %1546 = vmatpush3.msk.msra.mxu0 %vm270_vm3, %v433_v8  ;;  %1547 = vmatprep.mubr.msk.f32.mxu0 %vm1804_vm0, %v1803_v0 }
  0xb0   : > { %v276_v11 = vpop.permute.xlu0 %275  ;;  %v586_v12 = vpop.permute.xlu1 %585  ;;  %1555 = vmatprep.subr.mxu0 %v1803_v0 }
  0xb1   : > { %1541 = vmatpush3.msk.msra.mxu1 %vm268_vm4, %v276_v11 }
  0xb2   : > { %1543 = vmatmul.mubr.msk.f32.vlgmr.msra.gmra.mxu1 %vm285_vm2, %v250_v9  ;;  %1548 = vmatmul.mubr.msk.f32.vlgmr.msra.gmra.mxu0 %vm285_vm2, %v252_v10 }
  0xb3   : > { %1550 = vmatprep.subr.mxu1 %v1803_v0  ;;  %1552 = vmatprep.mubr.msk.f32.mxu1 %vm1804_vm0, %v1803_v0 }
  0xb4   : > { %1551 = vmatpush3.msra.mxu1 %v1943_v1  ;;  %1556 = vmatpush3.msk.msra.mxu0 %vm271_vm5, %v586_v12  ;;  %v665_v15 = vpop.permute.xlu0 %664  ;;  %v744_v16 = vpop.permute.xlu1 %743 }
  0xb5   : > { %1557 = vmatprep.mubr.msk.f32.mxu0 %vm1804_vm0, %v1803_v0  ;;  %1560 = vmatprep.subr.mxu1 %v1803_v0 }
  0xb6   : > { %1553 = vmatmul.mubr.msk.f32.vlgmr.msra.gmra.mxu1 %vm285_vm2, %v253_v13  ;;  %1558 = vmatmul.mubr.msk.f32.vlgmr.msra.gmra.mxu0 %vm285_vm2, %v254_v14 }
  0xb7   : > { %1565 = vmatprep.subr.mxu0 %v1803_v0  ;;  %1561 = vmatpush3.msk.msra.mxu1 %vm272_vm6, %v665_v15 }
  0xb8   : > { %1562 = vmatprep.mubr.msk.f32.mxu1 %vm1804_vm0, %v1803_v0  ;;  %1566 = vmatpush3.msk.msra.mxu0 %vm273_vm7, %v744_v16 }
  0xb9   : > { %1567 = vmatprep.mubr.msk.f32.mxu0 %vm1804_vm0, %v1803_v0  ;;  %1570 = vmatprep.subr.mxu1 %v1803_v0 }
  0xba   : > { %1563 = vmatmul.mubr.msk.f32.vlgmr.msra.gmra.mxu1 %vm285_vm2, %v255_v17  ;;  %1568 = vmatmul.mubr.msk.f32.vlgmr.msra.gmra.mxu0 %vm285_vm2, %v256_v18 }
  0xbb   : > { %1572 = vmatprep.mubr.msk.f32.mxu1 %vm1804_vm0, %v1803_v0  ;;  %1575 = vmatprep.subr.mxu0 %v1803_v0 }
  0xbc   : > { %1577 = vmatprep.mubr.msk.f32.mxu0 %vm1804_vm0, %v1803_v0 }
  0xc1   : > { %v825_v36 = vpop.permute.xlu0 %824 }
 0x16e   : > { %v355_v19 = vpop.f32.mrf.mxu0 }
 0x170   : > { %v1539_v20 = vpop.f32.mrf.mxu0 }
 0x172   : > { %v428_v21 = vpop.f32.mrf.mxu1  ;;  %v506_v22 = vpop.f32.mrf.mxu0 }
 0x173   : > { %v429_v23 = vadd.f32 %v428_v21, %v355_v19 }
 0x174   : > { %v1544_v24 = vpop.f32.mrf.mxu1  ;;  %v1549_v25 = vpop.f32.mrf.mxu0 }
 0x175   : > { %v510_v26 = vadd.f32 %v506_v22, %v429_v23 }
 0x176   : > { %v580_v27 = vpop.f32.mrf.mxu1  ;;  %v659_v28 = vpop.f32.mrf.mxu0 }
 0x177   : > { %v584_v29 = vadd.f32 %v580_v27, %v510_v26 }
 0x178   : > { %v1554_v30 = vpop.f32.mrf.mxu1  ;;  %v1559_v31 = vpop.f32.mrf.mxu0 }
 0x179   : > { %v663_v32 = vadd.f32 %v659_v28, %v584_v29 }
 0x17a   : > { %v738_v33 = vpop.f32.mrf.mxu1  ;;  %v817_v34 = vpop.f32.mrf.mxu0 }
 0x17b   : > { %v742_v35 = vadd.f32 %v738_v33, %v663_v32 }
 0x17c   : > { %v1564_v37 = vpop.f32.mrf.mxu1  ;;  %v1569_v38 = vpop.f32.mrf.mxu0 }
 0x17d   : > { %v821_v39 = vadd.f32 %v817_v34, %v742_v35 }
 0x17f   : > { %v827_v40 = vadd.f32 %v825_v36, %v821_v39 }
 0x181   : > { %v828_v41 = vmax.f32 %v827_v40, 0.0 }
 0x183   : > { %981 = vrot.lane.b32.xlu0 %v828_v41, %s1806_s9  ;;  %832 = vrot.lane.b32.xlu1 %v828_v41, %s1805_s8  ;;  %s1384_s9 = scalar_lea.hbm %s2092_s5, %s1504_s26 }
 0x187   : > { %1209 = vrot.lane.b32.xlu0 %v828_v41, %s1811_s13  ;;  %829 = vrot.lane.b32.xlu1 %v828_v41, %s1808_s10  ;;  %s1373_s10 = scalar_lea.sflag [#allocation4], %s243_s23 }
 0x18b   : > { %1365 = vperm.xlu0 %1676, %v265_v42   ;;  %1132 = vrot.lane.b32.xlu1 %v828_v41, %s1809_s11  ;;  %s1729_s11 = scalar_lea.vmem %s1387_s6, 128 }
 0x18c   : > { %p1730_p10 = scmp.ne.s32.totalorder %s1387_s6, %s1729_s11 }
 0x18e   : > { %p1731_p12 = pnand %p1730_p10, %p1881_p5 }
 0x18f   : > { %1286 = vrot.lane.b32.xlu1 %v828_v41, %s1810_s12  ;;  %s1812_s12 = smov [#allocation7]  }
 0x190   : > { %p1732_p8 = pneg %p1731_p12  ;;  %s1733_s13 = sshll.u32 %s1812_s12, 4  ;;  %s1734_s13 = int_to_ptr.vmem [resolvable:$false] %s1733_s13 }
 0x191   : > { %s1735_s22 = scalar_lea.vmem %s1734_s13, 256  ;;  %p1736_p11 = scmp.lt.s32.totalorder %s1387_s6, %s1734_s13 }
 0x192   : > { %p1737_p0 = scmp.lt.s32.totalorder %s1735_s22, %s1729_s11 }
 0x194   : > { %p1738_p1 = por %p1737_p0, %p1736_p11 }
 0x196   : > { %p1739_p3 = pnand %p1738_p1, %p1732_p8 }
 0x1f5   : > { %v833_v44 = vpop.permute.xlu1 %832  ;;  %v982_v45 = vpop.permute.xlu0 %981 }
 0x1f6   : > { %1571 = vmatpush3.msk.msra.mxu1 %vm269_vm1, %v833_v44 }
 0x1f7   : > { %1580 = vmatprep.subr.mxu1 %v1803_v0  ;;  %1573 = vmatmul.mubr.msk.f32.vlgmr.msra.gmra.mxu1 %vm285_vm2, %v258_v43 }
 0x1f8   : > { %1581 = vmatpush3.msk.msra.mxu1 %vm270_vm3, %v982_v45  ;;  %1582 = vmatprep.mubr.msk.f32.mxu1 %vm1804_vm0, %v1803_v0 }
 0x1f9   : > { %v830_v47 = vpop.permute.xlu1 %829  ;;  %1590 = vmatprep.subr.mxu1 %v1803_v0  ;;  %v1210_v52 = vpop.permute.xlu0 %1209 }
 0x1fa   : > { %1576 = vmatpush3.msk.msra.mxu0 %vm268_vm4, %v830_v47 }
 0x1fb   : > { %1578 = vmatmul.mubr.msk.f32.vlgmr.msra.gmra.mxu0 %vm285_vm2, %v257_v46  ;;  %1585 = vmatprep.subr.mxu0 %v1803_v0 }
 0x1fc   : > { %1586 = vmatpush3.msra.mxu0 %v828_v41  ;;  %1583 = vmatmul.mubr.msk.f32.vlgmr.msra.gmra.mxu1 %vm285_vm2, %v259_v48 }
 0x1fd   : > { %v1133_v50 = vpop.permute.xlu1 %1132  ;;  %1587 = vmatprep.mubr.msk.f32.mxu0 %vm1804_vm0, %v1803_v0  ;;  %1595 = vmatprep.subr.mxu0 %v1803_v0 }
 0x1fe   : > { %1591 = vmatpush3.msk.msra.mxu1 %vm271_vm5, %v1133_v50  ;;  %1592 = vmatprep.mubr.msk.f32.mxu1 %vm1804_vm0, %v1803_v0 }
 0x1ff   : > { %1588 = vmatmul.mubr.msk.f32.vlgmr.msra.gmra.mxu0 %vm285_vm2, %v260_v49  ;;  %1600 = vmatprep.subr.mxu1 %v1803_v0 }
 0x200   : > { %1596 = vmatpush3.msk.msra.mxu0 %vm272_vm6, %v1210_v52  ;;  %1593 = vmatmul.mubr.msk.f32.vlgmr.msra.gmra.mxu1 %vm285_vm2, %v261_v51 }
 0x201   : > { %v1287_v54 = vpop.permute.xlu1 %1286  ;;  %1597 = vmatprep.mubr.msk.f32.mxu0 %vm1804_vm0, %v1803_v0  ;;  %1602 = vmatprep.mubr.msk.f32.mxu1 %vm1804_vm0, %v1803_v0 }
 0x202   : > { %1601 = vmatpush3.msk.msra.mxu1 %vm273_vm7, %v1287_v54 }
 0x203   : > { %1598 = vmatmul.mubr.msk.f32.vlgmr.msra.gmra.mxu0 %vm285_vm2, %v262_v53 }
 0x204   : > { %1603 = vmatmul.mubr.msk.f32.vlgmr.msra.gmra.mxu1 %vm285_vm2, %v263_v55 }
 0x206   : > { %v1366_v13 = vpop.permute.xlu0 %1365 }
 0x2b7   : > { %v904_v56 = vpop.f32.mrf.mxu1 }
 0x2b9   : > { %v1574_v57 = vpop.f32.mrf.mxu1 }
 0x2bb   : > { %v977_v58 = vpop.f32.mrf.mxu0 }
 0x2bc   : > { %v978_v59 = vadd.f32 %v977_v58, %v904_v56  ;;  %v1053_v60 = vpop.f32.mrf.mxu1 }
 0x2bd   : > { %v1579_v61 = vpop.f32.mrf.mxu0 }
 0x2be   : > { %v1057_v62 = vadd.f32 %v1053_v60, %v978_v59  ;;  %v1584_v63 = vpop.f32.mrf.mxu1 }
 0x2bf   : > { %v1127_v2 = vpop.f32.mrf.mxu0 }
 0x2c0   : > { %v1131_v0 = vadd.f32 %v1127_v2, %v1057_v62  ;;  %v1204_v3 = vpop.f32.mrf.mxu1 }
 0x2c1   : > { %v1589_v4 = vpop.f32.mrf.mxu0 }
 0x2c2   : > { %v1208_v5 = vadd.f32 %v1204_v3, %v1131_v0  ;;  %v1594_v6 = vpop.f32.mrf.mxu1 }
 0x2c3   : > { %v1281_v7 = vpop.f32.mrf.mxu0 }
 0x2c4   : > { %v1285_v8 = vadd.f32 %v1281_v7, %v1208_v5  ;;  %v1358_v9 = vpop.f32.mrf.mxu1 }
 0x2c5   : > { %v1599_v10 = vpop.f32.mrf.mxu0 }
 0x2c6   : > { %v1362_v11 = vadd.f32 %v1358_v9, %v1285_v8  ;;  %v1604_v12 = vpop.f32.mrf.mxu1 }
 0x2c8   : > { %v1368_v14 = vadd.f32 %v1366_v13, %v1362_v11 }
 0x2ca   : > { %v1369_v15 = vadd.f32 %v1368_v14, %v1943_v1 }
 0x2cc   : > { %v1370_v16 = vmax.f32 %v1369_v15, 0.0 }
 0x2ce   : > { %1371 = vst [vmem:[%s245_s30] sm:$0xff] %v1370_v16 }
 0x2cf   : > { %1742 = shalt.err (!%p1739_p3)
}
 0x2d0   : > { %s1743_s14 = scalar_lea.hbm %s1384_s9, 128  ;;  %s1747_s17 = scalar_lea.hbm %s2092_s5, 256 }
 0x2d1   : > { %p1744_p2 = scmp.ne.s32.totalorder %s1384_s9, %s1743_s14  ;;  %p1748_p7 = scmp.lt.s32.totalorder %s1384_s9, %s2092_s5 }
 0x2d2   : > { %p1749_p6 = scmp.lt.s32.totalorder %s1747_s17, %s1743_s14 }
 0x2d3   : > { %p1745_p4 = pnand %p1744_p2, %p1881_p5 }
 0x2d4   : > { %p1750_p9 = por %p1749_p6, %p1748_p7 }
 0x2d5   : > { %p1746_p13 = pneg %p1745_p4 }
 0x2d7   : > { %p1751_p10 = pnand %p1750_p9, %p1746_p13 }
 0x2d9   : > { %1754 = shalt.err (!%p1751_p10)
}
 0x2da   : > { %1613 = dma.vmem_to_hbm [thread:$0]  (%p1881_p5), %s1387_s6, 128, %s1384_s9, %s1373_s10  }
 0x2db PF: > { %p1630_p12 = scmp.ge.s32.totalorder %s1797_s21, 2  ;;  %s1398_s26 = sand.u32 1, %s1785_s18  }
 0x2dc   : > { %p2102_p8 = scmp.ne.s32.totalorder %s2095_s29, 0  ;;  %s1399_s30 = scalar_lea.sflag [#allocation4], %s1398_s26 }
 0x2de   : > { %p1623_p11 = pnand %p1630_p12, %p2102_p8 }
 0x2e0   : > { %p1624_p0 = pneg %p1623_p11 }
 0x2e2   : > { %1780 = dma.done.wait (%p1624_p0), %s1399_s30, 128  }
 0x2e3   : > { %1782 = vsyncadd (%p1624_p0), %s1399_s30, 4294967168  ;;  %p17_p1 = scmp.ge.s32.totalorder %s1868_s24, 4   ;;  %s2103_s18 = smov %s1789_s19 }
 0x2e4   : > { %s2104_s19 = smov %s1793_s20  ;;  %s2105_s20 = smov %s1879_s27 }
 0x2e5   : > { %s2106_s21 = smov %s1868_s24  ;;  %19 = sbr.rel (!%p17_p1) target bundleno = 5 (0x5), region = 84 }
 0x2ea   :  { %1404 = vsyncpa [#allocation3], 1 }
 0x2eb   :  { %1406 = vsyncpa [#allocation3 + $0x1], 1 }
 0x2ec   :  { %1407 = vsyncpa [#allocation6], 1 }
 0x2ed   :  { %1408 = vsyncpa [#allocation4], 1 }
 0x2ee   :  { %1410 = vsyncpa [#allocation4 + $0x1], 1 }

</bundles_post_ra>
